<compile_context>
chip_gen: v7x
topology: tpu7x:2x2x1
jax: 0.10.0
libtpu: 0.0.40
codegen_flags: <defaults>
</compile_context>

<pallas_src>
import functools
import math

import jax
import jax.numpy as jnp
from jax.experimental import pallas as pl
from jax.experimental.pallas import tpu as pltpu


LANE = 128              # lane width / MXU column granularity
SUBLANE_F32 = 8         # f32 sublane granularity
TM_PREF = 256           # preferred batch tile
TN_PREF = 512           # preferred output tile (generic linear)
TK_PREF = 2048          # preferred reduction tile
MAX_PAD_WASTE = 1.0 / 16.0              # <= 6.25% zero padding on K
WF_RESIDENT_MAX_BYTES = 8 * 1024 * 1024  # keep extractor weight VMEM-resident


def _round_up(x, m):
    return ((x + m - 1) // m) * m


@functools.lru_cache(maxsize=None)
def _vmem_limit_bytes():
    """Generation-aware VMEM budget (v7x: 64 MiB physical, v5e/v6e: 128 MiB)."""
    try:
        info = pltpu.get_tpu_info()
        cap = int(getattr(info, "vmem_capacity_bytes", 64 * 1024 * 1024))
    except Exception:
        cap = 64 * 1024 * 1024
    return int(min(cap * 3 // 4, 96 * 1024 * 1024))


def _pick_tile(padded_dim, preferred, align):
    """Largest tile <= preferred (multiple of align) dividing padded_dim."""
    if padded_dim <= preferred:
        return padded_dim
    t = (preferred // align) * align
    while padded_dim % t != 0:
        t -= align
    return t


def _choose_pad_and_tile(dim, preferred, align, max_waste=MAX_PAD_WASTE):
    """(padded_dim, tile) with tile | padded_dim, tile % align == 0, bounded
    zero-padding.  Avoids degenerate tiny reduction tiles when `dim` has an
    awkward factorization (review item)."""
    dim_al = _round_up(dim, align)
    if dim_al <= preferred:
        return dim_al, dim_al
    t = max(align, (preferred // align) * align)
    while t > align:
        p = _round_up(dim, t)
        if (p - dim) <= max_waste * dim:
            return p, t
        t //= 2
    return dim_al, align


def _pick_tm(M_pad, preferred):
    tm = _pick_tile(M_pad, preferred, SUBLANE_F32)
    # v7x megacore: give the "parallel" batch axis >= 2 steps when possible so
    # both TensorCores get work (harmless no-op on single-TC v5e/v6e).
    if M_pad // tm < 2 and M_pad % (2 * SUBLANE_F32) == 0:
        tm = M_pad // 2
    return tm


# ---------------------------------------------------------------------------
# Fused kernel: logits = ((x @ Wf_t + bf) @ Wc_t + bc), features stay in VMEM.
# Grid: (M_pad // tm, K_pad // tk).  F and N are small (padded to 128), so Wc
# and the feature accumulator live fully in VMEM; Wf is VMEM-resident too when
# it fits (single HBM fetch thanks to the constant block index).
# ---------------------------------------------------------------------------
def _fused_kernel(x_ref, wf_ref, bf_ref, wc_ref, bc_ref, o_ref, feat_acc,
                  *, tk, wf_resident):
    k = pl.program_id(1)

    @pl.when(k == 0)
    def _init():
        feat_acc[...] = jnp.zeros_like(feat_acc)

    # x streamed as f32, cast to bf16 in-register right before the MXU:
    # avoids materializing a padded bf16 copy of x in HBM.
    x_blk = x_ref[...].astype(wf_ref.dtype)
    if wf_resident:
        # Whole Wf is resident (fetched once); slice the current K chunk here.
        wf_blk = wf_ref[pl.ds(pl.multiple_of(k * tk, tk), tk), :]
    else:
        wf_blk = wf_ref[...]
    feat_acc[...] += jnp.dot(x_blk, wf_blk, preferred_element_type=jnp.float32)

    @pl.when(k == pl.num_programs(1) - 1)
    def _finalize():
        # NOTE: features are intentionally quantized to bf16 between the two
        # matmuls (bf16 operands, f32 MXU accumulation) -- covered by the test
        # tolerances; a deliberate precision trade-off.
        feats = (feat_acc[...] + bf_ref[...]).astype(wc_ref.dtype)
        logits = jnp.dot(feats, wc_ref[...], preferred_element_type=jnp.float32)
        o_ref[...] = (logits + bc_ref[...]).astype(o_ref.dtype)


def fused_linear_classifier(x_pad, wf_t, bf, wc_t, bc, *, tm, tk):
    """x_pad (M,K) f32, wf_t (K,F) bf16, bf (1,F) f32, wc_t (F,N) bf16,
    bc (1,N) f32 -> (M,N) f32 logits.  All dims pre-padded/aligned."""
    M, K = x_pad.shape
    K2, F = wf_t.shape
    F2, N = wc_t.shape
    assert K == K2 and F == F2 and M % tm == 0 and K % tk == 0

    grid_m, grid_k = M // tm, K // tk
    wf_bytes = wf_t.size * wf_t.dtype.itemsize
    wf_resident = wf_bytes <= WF_RESIDENT_MAX_BYTES
    if wf_resident:
        wf_spec = pl.BlockSpec((K, F), lambda i, k: (0, 0))   # fetched once
        wf_traffic = wf_bytes
    else:
        wf_spec = pl.BlockSpec((tk, F), lambda i, k: (k, 0))  # streamed per k
        wf_traffic = wf_bytes * grid_m                        # once per M tile

    flops = 2 * M * K * F + 2 * M * F * N
    bytes_accessed = (x_pad.size * x_pad.dtype.itemsize
                      + wf_traffic
                      + wc_t.size * wc_t.dtype.itemsize
                      + (bf.size + bc.size) * 4
                      + M * N * 4)

    kernel = functools.partial(_fused_kernel, tk=tk, wf_resident=wf_resident)
    return pl.pallas_call(
        kernel,
        out_shape=jax.ShapeDtypeStruct((M, N), jnp.float32),
        grid_spec=pltpu.PrefetchScalarGridSpec(
            num_scalar_prefetch=0,
            grid=(grid_m, grid_k),
            in_specs=[
                # If xprof still shows exposed input DMA on v7x, add
                # pipeline_mode=pl.Buffered(3) to this x BlockSpec.
                pl.BlockSpec((tm, tk), lambda i, k: (i, k)),
                wf_spec,
                pl.BlockSpec((1, F), lambda i, k: (0, 0)),
                pl.BlockSpec((F, N), lambda i, k: (0, 0)),
                pl.BlockSpec((1, N), lambda i, k: (0, 0)),
            ],
            out_specs=pl.BlockSpec((tm, N), lambda i, k: (i, 0)),
            scratch_shapes=[pltpu.VMEM((tm, F), jnp.float32)],
        ),
        compiler_params=pltpu.CompilerParams(
            dimension_semantics=("parallel", "arbitrary"),
            vmem_limit_bytes=_vmem_limit_bytes(),
        ),
        cost_estimate=pl.CostEstimate(
            flops=flops, transcendentals=0, bytes_accessed=bytes_accessed),
    )(x_pad, wf_t, bf, wc_t, bc)


# ---------------------------------------------------------------------------
# Generic tiled linear kernel: y = x @ W_t + b  (W_t already (in, out)).
# Grid: (M//tm, N//tn, K//tk) with f32 accumulator, bias added on last K step.
# ---------------------------------------------------------------------------
def _linear_kernel(x_ref, wt_ref, b_ref, o_ref, acc_ref):
    k = pl.program_id(2)

    @pl.when(k == 0)
    def _init():
        acc_ref[...] = jnp.zeros_like(acc_ref)

    acc_ref[...] += jnp.dot(x_ref[...].astype(wt_ref.dtype), wt_ref[...],
                            preferred_element_type=jnp.float32)

    @pl.when(k == pl.num_programs(2) - 1)
    def _finalize():
        o_ref[...] = (acc_ref[...] + b_ref[...]).astype(o_ref.dtype)


def pallas_linear(x_pad, wt_pad, b_pad, *, tm, tn, tk, out_dtype=jnp.float32):
    """x_pad (M,K), wt_pad (K,N) bf16, b_pad (1,N) f32 -> (M,N) out_dtype.
    All dims pre-padded so tm|M, tn|N, tk|K."""
    M, K = x_pad.shape
    K2, N = wt_pad.shape
    assert K == K2 and M % tm == 0 and N % tn == 0 and K % tk == 0
    grid_m, grid_n, grid_k = M // tm, N // tn, K // tk

    flops = 2 * M * K * N
    out_itemsize = jnp.dtype(out_dtype).itemsize
    bytes_accessed = (x_pad.size * x_pad.dtype.itemsize * grid_n   # x per N tile
                      + wt_pad.size * wt_pad.dtype.itemsize * grid_m  # W per M tile
                      + b_pad.size * 4 * grid_m
                      + M * N * out_itemsize)

    return pl.pallas_call(
        _linear_kernel,
        out_shape=jax.ShapeDtypeStruct((M, N), out_dtype),
        grid_spec=pltpu.PrefetchScalarGridSpec(
            num_scalar_prefetch=0,
            grid=(grid_m, grid_n, grid_k),
            in_specs=[
                pl.BlockSpec((tm, tk), lambda i, j, k: (i, k)),
                pl.BlockSpec((tk, tn), lambda i, j, k: (k, j)),
                pl.BlockSpec((1, tn), lambda i, j, k: (0, j)),
            ],
            out_specs=pl.BlockSpec((tm, tn), lambda i, j, k: (i, j)),
            scratch_shapes=[pltpu.VMEM((tm, tn), jnp.float32)],
        ),
        compiler_params=pltpu.CompilerParams(
            dimension_semantics=("parallel", "parallel", "arbitrary"),
            vmem_limit_bytes=_vmem_limit_bytes(),
        ),
        cost_estimate=pl.CostEstimate(
            flops=flops, transcendentals=0, bytes_accessed=bytes_accessed),
    )(x_pad, wt_pad, b_pad)


# ---------------------------------------------------------------------------
# Module-level forward + params
# ---------------------------------------------------------------------------
def _pad_x_f32(x_flat, K_pad):
    """Pad x (kept f32) to (M_pad, K_pad) with one jnp.pad; no bf16 HBM copy.
    NOTE: padded batch rows produce bias-only rows that are sliced off (a
    little wasted MXU/HBM work when B << M_pad)."""
    B, K = x_flat.shape
    M_pad = _round_up(B, SUBLANE_F32)
    x_f32 = x_flat.astype(jnp.float32)
    if M_pad != B or K_pad != K:
        x_f32 = jnp.pad(x_f32, ((0, M_pad - B), (0, K_pad - K)))
    return x_f32, _pick_tm(M_pad, TM_PREF)


def linear_classifier_forward(x_nchw, params):
    """LinearClassifier.forward: features = trained_model(x); Linear(features).

    TODO(synk): the real trained_model architecture is external/unspecified; a
    frozen linear projection stands in for it, which lets both matmuls fuse
    into a single Pallas kernel (features never leave VMEM).
    """
    B = x_nchw.shape[0]
    num_classes = params["cls_w"].shape[0]

    x_flat = x_nchw.reshape(B, -1)                    # row-major NCHW flatten
    K_pad = params["feat_wt_pad"].shape[0]
    x_pad, tm = _pad_x_f32(x_flat, K_pad)
    tk = _pick_tile(K_pad, TK_PREF, LANE)

    logits_pad = fused_linear_classifier(
        x_pad, params["feat_wt_pad"], params["feat_b_pad"],
        params["cls_wt_pad"], params["cls_b_pad"], tm=tm, tk=tk)
    return logits_pad[:B, :num_classes]


def linear_classifier_forward_two_stage(x_nchw, params):
    """Same forward, but extractor and classifier head run as two separate
    tiled Pallas linear kernels (path for a non-fusible trained_model).
    Intermediate features are emitted directly in bf16 by the first kernel."""
    B = x_nchw.shape[0]
    num_classes = params["cls_w"].shape[0]
    cdt = params["feat_wt_pad"].dtype

    x_flat = x_nchw.reshape(B, -1)
    K_pad, F_pad = params["feat_wt_pad"].shape
    N_pad = params["cls_wt_pad"].shape[1]

    x_pad, tm = _pad_x_f32(x_flat, K_pad)
    feats_pad = pallas_linear(
        x_pad, params["feat_wt_pad"], params["feat_b_pad"],
        tm=tm, tn=_pick_tile(F_pad, TN_PREF, LANE),
        tk=_pick_tile(K_pad, TK_PREF, LANE), out_dtype=cdt)
    logits_pad = pallas_linear(
        feats_pad, params["cls_wt_pad"], params["cls_b_pad"],
        tm=tm, tn=_pick_tile(N_pad, TN_PREF, LANE),
        tk=_pick_tile(F_pad, TK_PREF, LANE))
    return logits_pad[:B, :num_classes]


def init_params(key, flat_dim, in_size, num_classes,
                compute_dtype=jnp.bfloat16):
    """Frozen stand-in feature extractor + classifier head.

    Kernel copies of the frozen weights are stored pre-transposed ((in, out)),
    zero-padded to lane-dense shapes and pre-cast to bf16 so the forward path
    does no per-call transpose / pad / cast on weights.  K is padded so a big
    reduction tile divides it evenly."""
    k1, k2, k3, k4 = jax.random.split(key, 4)
    fbound = 1.0 / math.sqrt(flat_dim)
    cbound = 1.0 / math.sqrt(in_size)

    feat_w = jax.random.uniform(k1, (in_size, flat_dim), jnp.float32, -fbound, fbound)
    feat_b = jax.random.uniform(k2, (in_size,), jnp.float32, -fbound, fbound)
    cls_w = jax.random.uniform(k3, (num_classes, in_size), jnp.float32, -cbound, cbound)
    cls_b = jax.random.uniform(k4, (num_classes,), jnp.float32, -cbound, cbound)

    K_pad, _ = _choose_pad_and_tile(flat_dim, TK_PREF, LANE)
    F_pad = _round_up(in_size, LANE)
    N_pad = _round_up(num_classes, LANE)

    def pad2d(a, r, c):
        return jnp.zeros((r, c), a.dtype).at[:a.shape[0], :a.shape[1]].set(a)

    return {
        # logical f32 parameters (PyTorch layout) — used for the reference check
        "feat_w": feat_w, "feat_b": feat_b, "cls_w": cls_w, "cls_b": cls_b,
        # kernel-ready copies
        "feat_wt_pad": pad2d(feat_w.T, K_pad, F_pad).astype(compute_dtype),
        "feat_b_pad": pad2d(feat_b.reshape(1, -1), 1, F_pad),
        "cls_wt_pad": pad2d(cls_w.T, F_pad, N_pad).astype(compute_dtype),
        "cls_b_pad": pad2d(cls_b.reshape(1, -1), 1, N_pad),
    }


if __name__ == "__main__":
    B, C, H, W = 2, 4, 16, 16
    in_size, num_classes = 32, 8

    key = jax.random.PRNGKey(0)
    kx, kp = jax.random.split(key)
    x = jax.random.normal(kx, (B, C, H, W), dtype=jnp.float32)
    params = init_params(kp, C * H * W, in_size, num_classes)

    logits = jax.block_until_ready(jax.jit(linear_classifier_forward)(x, params))
    logits2 = jax.block_until_ready(
        jax.jit(linear_classifier_forward_two_stage)(x, params))

    # Reference mirroring the kernel numerics (bf16 operands, f32 accumulate).
    x_flat = x.reshape(B, -1)
    x_bf = x_flat.astype(jnp.bfloat16).astype(jnp.float32)
    wf_bf = params["feat_w"].astype(jnp.bfloat16).astype(jnp.float32)
    wc_bf = params["cls_w"].astype(jnp.bfloat16).astype(jnp.float32)
    feats_ref = x_bf @ wf_bf.T + params["feat_b"]
    feats_bf = feats_ref.astype(jnp.bfloat16).astype(jnp.float32)
    logits_ref = feats_bf @ wc_bf.T + params["cls_b"]

    # Full-precision module reference (loose tolerance for bf16 compute).
    logits_f32 = (x_flat @ params["feat_w"].T + params["feat_b"]) @ params["cls_w"].T + params["cls_b"]

    assert logits.shape == (B, num_classes)
    assert logits2.shape == (B, num_classes)
    assert jnp.allclose(logits, logits_ref, atol=1e-2, rtol=1e-2), \
        f"fused max abs err {jnp.max(jnp.abs(logits - logits_ref))}"
    assert jnp.allclose(logits2, logits_ref, atol=1e-2, rtol=1e-2), \
        f"two-stage max abs err {jnp.max(jnp.abs(logits2 - logits_ref))}"
    assert jnp.allclose(logits, logits_f32, atol=5e-2, rtol=5e-2), \
        f"vs f32 ref max abs err {jnp.max(jnp.abs(logits - logits_f32))}"

    print("KERNEL_OK")
</pallas_src>

<mosaic_0001>
module attributes {stable_mosaic.version = 11 : i64} {
  func.func @_fused_kernel(%arg0: i32, %arg1: i32, %arg2: memref<8x1024xf32, #tpu.memory_space<vmem>>, %arg3: memref<1024x128xbf16, #tpu.memory_space<vmem>>, %arg4: memref<1x128xf32, #tpu.memory_space<vmem>>, %arg5: memref<128x128xbf16, #tpu.memory_space<vmem>>, %arg6: memref<1x128xf32, #tpu.memory_space<vmem>>, %arg7: memref<8x128xf32, #tpu.memory_space<vmem>>, %arg8: memref<8x128xf32, #tpu.memory_space<vmem>>) attributes {dimension_semantics = [#tpu.dimension_semantics<parallel>, #tpu.dimension_semantics<arbitrary>], iteration_bounds = array<i64: 1, 1>, scalar_prefetch = 0 : i64, scratch_operands = 1 : i64, tpu.core_type = #tpu.core_type<tc>, window_params = [{transform_indices = @transform_0, window_bounds = array<i64: 8, 1024>}, {pipeline_mode = #tpu.pipeline_mode<synchronous>, transform_indices = @transform_1, window_bounds = array<i64: 1024, 128>}, {pipeline_mode = #tpu.pipeline_mode<synchronous>, transform_indices = @transform_2, window_bounds = array<i64: 1, 128>}, {pipeline_mode = #tpu.pipeline_mode<synchronous>, transform_indices = @transform_3, window_bounds = array<i64: 128, 128>}, {pipeline_mode = #tpu.pipeline_mode<synchronous>, transform_indices = @transform_4, window_bounds = array<i64: 1, 128>}, {transform_indices = @transform_5, window_bounds = array<i64: 8, 128>}]} {
    %c0_i32 = arith.constant 0 : i32
    %0 = arith.cmpi eq, %arg1, %c0_i32 : i32
    %1 = arith.extui %0 : i1 to i32
    %c0_i32_0 = arith.constant 0 : i32
    %2 = arith.cmpi ne, %1, %c0_i32_0 : i32
    scf.if %2 {
      %cst_9 = arith.constant 0.000000e+00 : f32
      %16 = vector.broadcast %cst_9 : f32 to vector<8x128xf32>
      %c0_10 = arith.constant 0 : index
      %c0_11 = arith.constant 0 : index
      %17 = vector.load %arg8[%c0_10, %c0_11] : memref<8x128xf32, #tpu.memory_space<vmem>>, vector<8x128xf32>
      tpu.vector_store %arg8[%c0_10, %c0_11], %16 {strides = array<i32>} : memref<8x128xf32, #tpu.memory_space<vmem>>, vector<8x128xf32>,
    } else {
    }
    %c0 = arith.constant 0 : index
    %c0_1 = arith.constant 0 : index
    %3 = vector.load %arg2[%c0, %c0_1] : memref<8x1024xf32, #tpu.memory_space<vmem>>, vector<8x1024xf32>
    %4 = arith.truncf %3 : vector<8x1024xf32> to vector<8x1024xbf16>
    %c1024_i32 = arith.constant 1024 : i32
    %5 = arith.muli %arg1, %c1024_i32 : i32
    %6 = tpu.assume_multiple %5, 1024 : i32
    %7 = arith.index_cast %6 : i32 to index
    %c0_2 = arith.constant 0 : index
    %8 = vector.load %arg3[%7, %c0_2] : memref<1024x128xbf16, #tpu.memory_space<vmem>>, vector<1024x128xbf16>
    %c0_3 = arith.constant 0 : index
    %c0_4 = arith.constant 0 : index
    %9 = vector.load %arg8[%c0_3, %c0_4] : memref<8x128xf32, #tpu.memory_space<vmem>>, vector<8x128xf32>
    %cst = arith.constant dense<0.000000e+00> : vector<8x128xf32>
    %10 = tpu.matmul %4, %8, %cst {dimension_numbers = #tpu.dot_dimension_numbers<[1], [0], [0], [1], [0, 0, 1, 1], [], []>} : vector<8x1024xbf16>, vector<1024x128xbf16>, vector<8x128xf32> -> vector<8x128xf32>
    %11 = arith.addf %9, %10 : vector<8x128xf32>
    %c0_5 = arith.constant 0 : index
    %c0_6 = arith.constant 0 : index
    %12 = vector.load %arg8[%c0_5, %c0_6] : memref<8x128xf32, #tpu.memory_space<vmem>>, vector<8x128xf32>
    tpu.vector_store %arg8[%c0_5, %c0_6], %11 {strides = array<i32>} : memref<8x128xf32, #tpu.memory_space<vmem>>, vector<8x128xf32>,
    %c0_i32_7 = arith.constant 0 : i32
    %13 = arith.cmpi eq, %arg1, %c0_i32_7 : i32
    %14 = arith.extui %13 : i1 to i32
    %c0_i32_8 = arith.constant 0 : i32
    %15 = arith.cmpi ne, %14, %c0_i32_8 : i32
    scf.if %15 {
      %c0_9 = arith.constant 0 : index
      %c0_10 = arith.constant 0 : index
      %16 = vector.load %arg8[%c0_9, %c0_10] : memref<8x128xf32, #tpu.memory_space<vmem>>, vector<8x128xf32>
      %c0_11 = arith.constant 0 : index
      %c0_12 = arith.constant 0 : index
      %17 = vector.load %arg4[%c0_11, %c0_12] : memref<1x128xf32, #tpu.memory_space<vmem>>, vector<1x128xf32>
      %18 = vector.broadcast %17 : vector<1x128xf32> to vector<8x128xf32>
      %19 = arith.addf %16, %18 : vector<8x128xf32>
      %20 = arith.truncf %19 : vector<8x128xf32> to vector<8x128xbf16>
      %c0_13 = arith.constant 0 : index
      %c0_14 = arith.constant 0 : index
      %21 = vector.load %arg5[%c0_13, %c0_14] : memref<128x128xbf16, #tpu.memory_space<vmem>>, vector<128x128xbf16>
      %cst_15 = arith.constant dense<0.000000e+00> : vector<8x128xf32>
      %22 = tpu.matmul %20, %21, %cst_15 {dimension_numbers = #tpu.dot_dimension_numbers<[1], [0], [0], [1], [0, 0, 1, 1], [], []>} : vector<8x128xbf16>, vector<128x128xbf16>, vector<8x128xf32> -> vector<8x128xf32>
      %c0_16 = arith.constant 0 : index
      %c0_17 = arith.constant 0 : index
      %23 = vector.load %arg6[%c0_16, %c0_17] : memref<1x128xf32, #tpu.memory_space<vmem>>, vector<1x128xf32>
      %24 = vector.broadcast %23 : vector<1x128xf32> to vector<8x128xf32>
      %25 = arith.addf %22, %24 : vector<8x128xf32>
      %c0_18 = arith.constant 0 : index
      %c0_19 = arith.constant 0 : index
      %26 = vector.load %arg7[%c0_18, %c0_19] : memref<8x128xf32, #tpu.memory_space<vmem>>, vector<8x128xf32>
      tpu.vector_store %arg7[%c0_18, %c0_19], %25 {strides = array<i32>} : memref<8x128xf32, #tpu.memory_space<vmem>>, vector<8x128xf32>,
    } else {
    }
    return
  }
  func.func @transform_0(%arg0: i32, %arg1: i32) -> (i32, i32) {
    %c0_i32 = arith.constant 0 : i32
    return %arg0, %arg1 : i32, i32
  }
  func.func @transform_1(%arg0: i32, %arg1: i32) -> (i32, i32) {
    %c0_i32 = arith.constant 0 : i32
    %c0_i32_0 = arith.constant 0 : i32
    %c0_i32_1 = arith.constant 0 : i32
    return %c0_i32, %c0_i32_0 : i32, i32
  }
  func.func @transform_2(%arg0: i32, %arg1: i32) -> (i32, i32) {
    %c0_i32 = arith.constant 0 : i32
    %c0_i32_0 = arith.constant 0 : i32
    %c0_i32_1 = arith.constant 0 : i32
    return %c0_i32, %c0_i32_0 : i32, i32
  }
  func.func @transform_3(%arg0: i32, %arg1: i32) -> (i32, i32) {
    %c0_i32 = arith.constant 0 : i32
    %c0_i32_0 = arith.constant 0 : i32
    %c0_i32_1 = arith.constant 0 : i32
    return %c0_i32, %c0_i32_0 : i32, i32
  }
  func.func @transform_4(%arg0: i32, %arg1: i32) -> (i32, i32) {
    %c0_i32 = arith.constant 0 : i32
    %c0_i32_0 = arith.constant 0 : i32
    %c0_i32_1 = arith.constant 0 : i32
    return %c0_i32, %c0_i32_0 : i32, i32
  }
  func.func @transform_5(%arg0: i32, %arg1: i32) -> (i32, i32) {
    %c0_i32 = arith.constant 0 : i32
    %c0_i32_0 = arith.constant 0 : i32
    return %arg0, %c0_i32 : i32, i32
  }
}

</mosaic_0001>

<bundles_post_ra>
// kernel: linear_classifier_forward.1
= control target key start
LH: loop header
LB: loop body
LE: loop exit
PB: predicated region body
PF: predicated region fallthrough
CT: control target
= control target key end

     0   :  { %10 = vsyncpa [#allocation4], 0  ;;  %s1160_s18 = smov [#allocation3]   ;;  %s1264_s0 = inlined_call_operand.vmem [shape: f32[8,1024], index: 0, kind: input, shape index: {}]   ;;  %s1265_s1 = inlined_call_operand.hbm [shape: bf16[1024,128], index: 1, kind: input, shape index: {}]   ;;  %s1266_s2 = inlined_call_operand.vmem [shape: f32[1,128], index: 2, kind: input, shape index: {}]   ;;  %s1267_s3 = inlined_call_operand.vmem [shape: bf16[128,128], index: 3, kind: input, shape index: {}]   ;;  %s1268_s4 = inlined_call_operand.vmem [shape: f32[1,128], index: 4, kind: input, shape index: {}]   ;;  %s1269_s5 = inlined_call_operand.vmem [shape: f32[8,128], index: 5, kind: output, shape index: {}]  }
   0x1   :  { %s18_s19 = sshll.u32 %s1160_s18, 4  ;;  %s1136_s22 = scalar_lea.hbm %s1265_s1, 8192  ;;  %s19_s19 = int_to_ptr.vmem [resolvable:$true] %s18_s19 }
   0x2   :  { %p1137_p0 = scmp.ne.s32.totalorder %s1265_s1, %s1136_s22  ;;  %p1140_p1 = scmp.lt.u32.totalorder %s1136_s22, %s1265_s1 }
   0x4   :  { %p1142_p2 = pnand %p1140_p1, %p1137_p0 }
   0x6   :  { %1145 = shalt.err (!%p1142_p2)
}
   0x7   :  { %s1146_s27 = scalar_lea.vmem %s19_s19, 8192  ;;  %p1151_p4 = scmp.lt.s32.totalorder %s19_s19, %s19_s19 }
   0x8   :  { %p1147_p3 = scmp.ne.s32.totalorder %s19_s19, %s1146_s27  ;;  %p1152_p5 = scmp.lt.s32.totalorder %s1146_s27, %s1146_s27 }
   0xa   :  { %p1153_p6 = por %p1152_p5, %p1151_p4 }
   0xc   :  { %p1154_p7 = pnand %p1153_p6, %p1147_p3 }
   0xe   :  { %1157 = shalt.err (!%p1154_p7)
}
   0xf   :  { %s1161_s28 = smov 64   ;;  %s1162_s29 = smov 4  }
  0x10   :  { %24 = dma.hbm_to_vmem [thread:$0]  %s1265_s1, 8192, %s19_s19, [#allocation4], %s1161_s28, %s1161_s28, %s1162_s29  }
  0x11   :  { %1158 = dma.done.wait [#allocation4], 8192  }
  0x12   :  { %1159 = vsyncadd [#allocation4], 4294959104  ;;  %v1064_v0 = vld [vmem:[#allocation3 + $0x40] sm:$0xff]   ;;  %v1068_v4 = vld [vmem:[#allocation3 + $0x48] sm:$0xff]   ;;  %vm1164_vm0 = vmmov 0  }
  0x13   :  { %v1065_v1 = vld [vmem:[#allocation3 + $0xc0] sm:$0xff]   ;;  %942 = vmatprep.subr.bf16.mxu0 %v1064_v0  ;;  %v1069_v5 = vld [vmem:[#allocation3 + $0xc8] sm:$0xff]   ;;  %v1072_v8 = vld [vmem:[#allocation3 + $0x50] sm:$0xff]  }
  0x14   :  { %v1066_v2 = vld [vmem:[#allocation3] sm:$0xff]   ;;  %964 = vmatprep.subr.bf16.mxu1 %v1065_v1  ;;  %v1070_v6 = vld [vmem:[#allocation3 + $0x8] sm:$0xff]   ;;  %v1073_v9 = vld [vmem:[#allocation3 + $0xd0] sm:$0xff]  }
  0x15   :  { %v1067_v3 = vld [vmem:[#allocation3 + $0x80] sm:$0xff]   ;;  %943 = vmatpush3.bf16.msra.mxu0 %v1066_v2  ;;  %v1071_v7 = vld [vmem:[#allocation3 + $0x88] sm:$0xff]   ;;  %v1074_v10 = vld [vmem:[#allocation3 + $0x10] sm:$0xff]  }
  0x16   :  { %965 = vmatpush3.bf16.msra.mxu1 %v1067_v3  ;;  %944 = vmatprep.subr.bf16.mxu0 %v1068_v4  ;;  %v1075_v11 = vld [vmem:[#allocation3 + $0x90] sm:$0xff]   ;;  %v1076_v12 = vld [vmem:[#allocation3 + $0x58] sm:$0xff]   ;;  %v1080_v16 = vld [vmem:[#allocation3 + $0x60] sm:$0xff]  }
  0x17   :  { %966 = vmatprep.subr.bf16.mxu1 %v1069_v5  ;;  %v1077_v13 = vld [vmem:[#allocation3 + $0xd8] sm:$0xff]   ;;  %v1081_v17 = vld [vmem:[#allocation3 + $0xe0] sm:$0xff]   ;;  %v1084_v20 = vld [vmem:[#allocation3 + $0x68] sm:$0xff]  }
  0x18   :  { %v1078_v14 = vld [vmem:[#allocation3 + $0x18] sm:$0xff]   ;;  %v1082_v18 = vld [vmem:[#allocation3 + $0x20] sm:$0xff]   ;;  %v1085_v21 = vld [vmem:[#allocation3 + $0xe8] sm:$0xff]  }
  0x19   :  { %945 = vmatpush3.bf16.msra.mxu0 %v1070_v6  ;;  %v1079_v15 = vld [vmem:[#allocation3 + $0x98] sm:$0xff]   ;;  %v1083_v19 = vld [vmem:[#allocation3 + $0xa0] sm:$0xff]   ;;  %v1086_v22 = vld [vmem:[#allocation3 + $0x28] sm:$0xff]  }
  0x1a   :  { %967 = vmatpush3.bf16.msra.mxu1 %v1071_v7  ;;  %946 = vmatprep.subr.bf16.mxu0 %v1072_v8  ;;  %v1087_v23 = vld [vmem:[#allocation3 + $0xa8] sm:$0xff]   ;;  %v1088_v24 = vld [vmem:[#allocation3 + $0x70] sm:$0xff]   ;;  %v1092_v28 = vld [vmem:[#allocation3 + $0x78] sm:$0xff]  }
  0x1b   :  { %968 = vmatprep.subr.bf16.mxu1 %v1073_v9  ;;  %v1089_v25 = vld [vmem:[#allocation3 + $0xf0] sm:$0xff]   ;;  %v1093_v29 = vld [vmem:[#allocation3 + $0xf8] sm:$0xff]   ;;  %v41_v32 = vld [vmem:[%s1264_s0 + $0x8] sm:$0xff] }
  0x1c   :  { %v1090_v26 = vld [vmem:[#allocation3 + $0x30] sm:$0xff]   ;;  %v1094_v30 = vld [vmem:[#allocation3 + $0x38] sm:$0xff]   ;;  %v40_v34 = vld [vmem:[%s1264_s0] sm:$0xff]  ;;  %v49_v35 = vpack.c.bf16 %v41_v32, %v41_v32 }
  0x1d   :  { %947 = vmatpush3.bf16.msra.mxu0 %v1074_v10  ;;  %v1091_v27 = vld [vmem:[#allocation3 + $0xb0] sm:$0xff]   ;;  %v1095_v31 = vld [vmem:[#allocation3 + $0xb8] sm:$0xff]   ;;  %v48_v37 = vpack.c.bf16 %v40_v34, %v40_v34  ;;  %v1096_v40 = vld [vmem:[#allocation3 + $0x140] sm:$0xff]  }
  0x1e   :  { %969 = vmatpush3.bf16.msra.mxu1 %v1075_v11  ;;  %948 = vmatprep.subr.bf16.mxu0 %v1076_v12  ;;  %v43_v33 = vld [vmem:[%s1264_s0 + $0x18] sm:$0xff]  ;;  %v42_v38 = vld [vmem:[%s1264_s0 + $0x10] sm:$0xff]  ;;  %v1097_v41 = vld [vmem:[#allocation3 + $0x1c0] sm:$0xff]  }
  0x1f   :  { %970 = vmatprep.subr.bf16.mxu1 %v1077_v13  ;;  %v51_v36 = vpack.c.bf16 %v43_v33, %v43_v33  ;;  %v50_v39 = vpack.c.bf16 %v42_v38, %v42_v38  ;;  %606 = vmatprep.mubr.bf16.mxu0 %v49_v35  ;;  %v1098_v42 = vld [vmem:[#allocation3 + $0x100] sm:$0xff]   ;;  %v1100_v44 = vld [vmem:[#allocation3 + $0x148] sm:$0xff]   ;;  %v1104_v48 = vld [vmem:[#allocation3 + $0x150] sm:$0xff]  }
  0x20   :  { %v1099_v43 = vld [vmem:[#allocation3 + $0x180] sm:$0xff]   ;;  %v1101_v45 = vld [vmem:[#allocation3 + $0x1c8] sm:$0xff]   ;;  %v1105_v49 = vld [vmem:[#allocation3 + $0x1d0] sm:$0xff]  }
  0x21   :  { %949 = vmatpush3.bf16.msra.mxu0 %v1078_v14  ;;  %646 = vmatprep.mubr.bf16.mxu1 %v51_v36  ;;  %v1102_v46 = vld [vmem:[#allocation3 + $0x108] sm:$0xff]   ;;  %v1106_v50 = vld [vmem:[#allocation3 + $0x110] sm:$0xff]   ;;  %v1108_v52 = vld [vmem:[#allocation3 + $0x158] sm:$0xff]  }
  0x22   :  { %971 = vmatpush3.bf16.msra.mxu1 %v1079_v15  ;;  %950 = vmatprep.subr.bf16.mxu0 %v1080_v16  ;;  %v1103_v47 = vld [vmem:[#allocation3 + $0x188] sm:$0xff]   ;;  %v1107_v51 = vld [vmem:[#allocation3 + $0x190] sm:$0xff]   ;;  %v1109_v53 = vld [vmem:[#allocation3 + $0x1d8] sm:$0xff]  }
  0x23   :  { %972 = vmatprep.subr.bf16.mxu1 %v1081_v17  ;;  %v1110_v54 = vld [vmem:[#allocation3 + $0x118] sm:$0xff]   ;;  %v1112_v56 = vld [vmem:[#allocation3 + $0x160] sm:$0xff]   ;;  %v1116_v60 = vld [vmem:[#allocation3 + $0x168] sm:$0xff]   ;;  %v1163_v17 = vmov 0.0  }
  0x24   :  { %v1111_v55 = vld [vmem:[#allocation3 + $0x198] sm:$0xff]   ;;  %v1113_v57 = vld [vmem:[#allocation3 + $0x1e0] sm:$0xff]   ;;  %v1117_v61 = vld [vmem:[#allocation3 + $0x1e8] sm:$0xff]  }
  0x25   :  { %951 = vmatpush3.bf16.msra.mxu0 %v1082_v18  ;;  %v1114_v58 = vld [vmem:[#allocation3 + $0x120] sm:$0xff]   ;;  %v1118_v62 = vld [vmem:[#allocation3 + $0x128] sm:$0xff]   ;;  %v1120_v0 = vld [vmem:[#allocation3 + $0x170] sm:$0xff]  }
  0x26   :  { %973 = vmatpush3.bf16.msra.mxu1 %v1083_v19  ;;  %952 = vmatprep.subr.bf16.mxu0 %v1084_v20  ;;  %v1115_v59 = vld [vmem:[#allocation3 + $0x1a0] sm:$0xff]   ;;  %v1119_v63 = vld [vmem:[#allocation3 + $0x1a8] sm:$0xff]   ;;  %v1121_v1 = vld [vmem:[#allocation3 + $0x1f0] sm:$0xff]  }
  0x27   :  { %974 = vmatprep.subr.bf16.mxu1 %v1085_v21  ;;  %v1122_v2 = vld [vmem:[#allocation3 + $0x130] sm:$0xff]   ;;  %v1124_v4 = vld [vmem:[#allocation3 + $0x178] sm:$0xff]   ;;  %v45_v8 = vld [vmem:[%s1264_s0 + $0x28] sm:$0xff] }
  0x28   :  { %v1123_v3 = vld [vmem:[#allocation3 + $0x1b0] sm:$0xff]   ;;  %v1125_v5 = vld [vmem:[#allocation3 + $0x1f8] sm:$0xff]   ;;  %v53_v10 = vpack.c.bf16 %v45_v8, %v45_v8  ;;  %v44_v12 = vld [vmem:[%s1264_s0 + $0x20] sm:$0xff] }
  0x29   :  { %953 = vmatpush3.bf16.msra.mxu0 %v1086_v22  ;;  %v1126_v6 = vld [vmem:[#allocation3 + $0x138] sm:$0xff]   ;;  %v46_v13 = vld [vmem:[%s1264_s0 + $0x30] sm:$0xff]  ;;  %v52_v14 = vpack.c.bf16 %v44_v12, %v44_v12  ;;  %v1128_v16 = vld [vmem:[%s1267_s3] sm:$0xff]  }
  0x2a   :  { %975 = vmatpush3.bf16.msra.mxu1 %v1087_v23  ;;  %954 = vmatprep.subr.bf16.mxu0 %v1088_v24  ;;  %v1127_v7 = vld [vmem:[#allocation3 + $0x1b8] sm:$0xff]   ;;  %v54_v15 = vpack.c.bf16 %v46_v13, %v46_v13  ;;  %v1129_v18 = vld [vmem:[%s1267_s3 + $0x8] sm:$0xff]   ;;  %v1130_v19 = vld [vmem:[%s1267_s3 + $0x10] sm:$0xff]  }
  0x2b   :  { %976 = vmatprep.subr.bf16.mxu1 %v1089_v25  ;;  %v47_v9 = vld [vmem:[%s1264_s0 + $0x38] sm:$0xff]  ;;  %v1132_v21 = vld [vmem:[%s1267_s3 + $0x20] sm:$0xff]   ;;  %v1133_v22 = vld [vmem:[%s1267_s3 + $0x28] sm:$0xff]  }
  0x2c   :  { %v55_v11 = vpack.c.bf16 %v47_v9, %v47_v9  ;;  %v1131_v20 = vld [vmem:[%s1267_s3 + $0x18] sm:$0xff]   ;;  %v1134_v23 = vld [vmem:[%s1267_s3 + $0x30] sm:$0xff]  }
  0x2d   :  { %955 = vmatpush3.bf16.msra.mxu0 %v1090_v26  ;;  %v1135_v24 = vld [vmem:[%s1267_s3 + $0x38] sm:$0xff]  }
  0x2e   :  { %977 = vmatpush3.bf16.msra.mxu1 %v1091_v27  ;;  %956 = vmatprep.subr.bf16.mxu0 %v1092_v28 }
  0x2f   :  { %978 = vmatprep.subr.bf16.mxu1 %v1093_v29 }
  0x31   :  { %957 = vmatpush3.bf16.msra.mxu0 %v1094_v30 }
  0x32   :  { %979 = vmatpush3.bf16.msra.mxu1 %v1095_v31  ;;  %986 = vmatprep.subr.bf16.mxu0 %v1096_v40 }
  0x33   :  { %1008 = vmatprep.subr.bf16.mxu1 %v1097_v41 }
  0x34   :  { %607 = vmatmul.mubr.bf16.vlgmr.msra.gmra.mrb[0].mxu0 %v48_v37 }
  0x35   :  { %647 = vmatmul.mubr.bf16.vlgmr.msra.gmra.mrb[0].mxu1 %v50_v39  ;;  %987 = vmatpush3.bf16.msra.mxu0 %v1098_v42 }
  0x36   :  { %1009 = vmatpush3.bf16.msra.mxu1 %v1099_v43  ;;  %988 = vmatprep.subr.bf16.mxu0 %v1100_v44 }
  0x37   :  { %1010 = vmatprep.subr.bf16.mxu1 %v1101_v45  ;;  %686 = vmatprep.mubr.bf16.mxu0 %v53_v10 }
  0x38   :  { %726 = vmatprep.mubr.bf16.mxu1 %v55_v11 }
  0x39   :  { %989 = vmatpush3.bf16.msra.mxu0 %v1102_v46 }
  0x3a   :  { %1011 = vmatpush3.bf16.msra.mxu1 %v1103_v47  ;;  %990 = vmatprep.subr.bf16.mxu0 %v1104_v48  ;;  %v932_v47 = vld [vmem:[%s1266_s2] ss:$0 sm:$0xff] }
  0x3b   :  { %1012 = vmatprep.subr.bf16.mxu1 %v1105_v49 }
  0x3d   :  { %991 = vmatpush3.bf16.msra.mxu0 %v1106_v50 }
  0x3e   :  { %1013 = vmatpush3.bf16.msra.mxu1 %v1107_v51  ;;  %992 = vmatprep.subr.bf16.mxu0 %v1108_v52  ;;  %v933_v51 = vld [vmem:[%s1268_s4] ss:$0 sm:$0xff] }
  0x3f   :  { %1014 = vmatprep.subr.bf16.mxu1 %v1109_v53 }
  0x41   :  { %993 = vmatpush3.bf16.msra.mxu0 %v1110_v54 }
  0x42   :  { %1015 = vmatpush3.bf16.msra.mxu1 %v1111_v55  ;;  %994 = vmatprep.subr.bf16.mxu0 %v1112_v56 }
  0x43   :  { %1016 = vmatprep.subr.bf16.mxu1 %v1113_v57 }
  0x45   :  { %995 = vmatpush3.bf16.msra.mxu0 %v1114_v58 }
  0x46   :  { %1017 = vmatpush3.bf16.msra.mxu1 %v1115_v59  ;;  %996 = vmatprep.subr.bf16.mxu0 %v1116_v60 }
  0x47   :  { %1018 = vmatprep.subr.bf16.mxu1 %v1117_v61 }
  0x49   :  { %997 = vmatpush3.bf16.msra.mxu0 %v1118_v62 }
  0x4a   :  { %1019 = vmatpush3.bf16.msra.mxu1 %v1119_v63  ;;  %998 = vmatprep.subr.bf16.mxu0 %v1120_v0 }
  0x4b   :  { %1020 = vmatprep.subr.bf16.mxu1 %v1121_v1 }
  0x4d   :  { %999 = vmatpush3.bf16.msra.mxu0 %v1122_v2 }
  0x4e   :  { %1021 = vmatpush3.bf16.msra.mxu1 %v1123_v3  ;;  %1000 = vmatprep.subr.bf16.mxu0 %v1124_v4 }
  0x4f   :  { %1022 = vmatprep.subr.bf16.mxu1 %v1125_v5 }
  0x51   :  { %1001 = vmatpush3.bf16.msra.mxu0 %v1126_v6 }
  0x52   :  { %1023 = vmatpush3.bf16.msra.mxu1 %v1127_v7  ;;  %1039 = vmatprep.subr.bf16.mxu0 %v1163_v17 }
  0x54   :  { %687 = vmatmul.mubr.bf16.vlgmr.msra.gmra.mrb[4].mxu0 %v52_v14 }
  0x55   :  { %727 = vmatmul.mubr.bf16.vlgmr.msra.gmra.mrb[4].mxu1 %v54_v15  ;;  %1040 = vmatpush3.bf16.msra.mxu0 %v1128_v16 }
  0x56   :  { %1041 = vmatprep.subr.bf16.mxu0 %v1163_v17  ;;  %1055 = vmatprep.mubr.msk.bf16.mxu0 %vm1164_vm0, %v1163_v17 }
  0x59   :  { %1042 = vmatpush3.bf16.msra.mxu0 %v1129_v18 }
  0x5a   :  { %1043 = vmatprep.subr.bf16.mxu0 %v1163_v17 }
  0x5d   :  { %1044 = vmatpush3.bf16.msra.mxu0 %v1130_v19 }
  0x5e   :  { %1045 = vmatprep.subr.bf16.mxu0 %v1163_v17 }
  0x61   :  { %1046 = vmatpush3.bf16.msra.mxu0 %v1131_v20 }
  0x62   :  { %1047 = vmatprep.subr.bf16.mxu0 %v1163_v17 }
  0x65   :  { %1048 = vmatpush3.bf16.msra.mxu0 %v1132_v21 }
  0x66   :  { %1049 = vmatprep.subr.bf16.mxu0 %v1163_v17 }
  0x69   :  { %1050 = vmatpush3.bf16.msra.mxu0 %v1133_v22 }
  0x6a   :  { %1051 = vmatprep.subr.bf16.mxu0 %v1163_v17 }
  0x6d   :  { %1052 = vmatpush3.bf16.msra.mxu0 %v1134_v23 }
  0x6e   :  { %1053 = vmatprep.subr.bf16.mxu0 %v1163_v17 }
  0x71   :  { %1054 = vmatpush3.bf16.msra.mxu0 %v1135_v24 }
 0x107   :  { %v958_v25 = vpop.f32.mrb[0].mxu0 }
 0x108   :  { %v980_v26 = vpop.f32.mrb[0].mxu1  ;;  %v959_v27 = vpop.f32.mrb[1].mxu0 }
 0x109   :  { %v981_v28 = vpop.f32.mrb[1].mxu1  ;;  %v960_v29 = vadd.f32 %v959_v27, %v958_v25  ;;  %v961_v31 = vpop.f32.mrb[2].mxu0 }
 0x10a   :  { %v982_v30 = vadd.f32 %v981_v28, %v980_v26  ;;  %v983_v32 = vpop.f32.mrb[2].mxu1  ;;  %v962_v33 = vpop.f32.mrb[3].mxu0 }
 0x10b   :  { %v984_v34 = vpop.f32.mrb[3].mxu1 }
 0x10c   :  { %v649_v35 = vadd.f32 %v982_v30, %v960_v29 }
 0x127   :  { %v1002_v36 = vpop.f32.mrb[4].mxu0 }
 0x128   :  { %v1024_v37 = vpop.f32.mrb[4].mxu1  ;;  %v1003_v38 = vpop.f32.mrb[5].mxu0 }
 0x129   :  { %v1004_v39 = vadd.f32 %v1003_v38, %v1002_v36  ;;  %v1025_v40 = vpop.f32.mrb[5].mxu1  ;;  %v1005_v41 = vpop.f32.mrb[6].mxu0 }
 0x12a   :  { %v1026_v42 = vadd.f32 %v1025_v40, %v1024_v37  ;;  %v1027_v43 = vpop.f32.mrb[6].mxu1  ;;  %v1006_v44 = vpop.f32.mrb[7].mxu0 }
 0x12b   :  { %v689_v45 = vadd.f32 %v1004_v39, %v649_v35  ;;  %v1028_v46 = vpop.f32.mrb[7].mxu1 }
 0x12d   :  { %v729_v48 = vadd.f32 %v1026_v42, %v689_v45 }
 0x12f   :  { %v747_v49 = vadd.f32 %v932_v47, %v729_v48 }
 0x131   :  { %v748_v50 = vpack.c.bf16 %v747_v49, %v747_v49 }
 0x133   :  { %1056 = vmatmul.mubr.bf16.vlgmr.msra.gmra.mrb[8].mxu0 %v748_v50 }
 0x206   :  { %v854_v52 = vpop.f32.mrb[8].mxu0 }
 0x207   :  { %v855_v53 = vadd.f32 %v933_v51, %v854_v52  ;;  %v1057_v54 = vpop.f32.mrb[9].mxu0 }
 0x208   :  { %v857_v55 = vpop.f32.mrb[10].mxu0 }
 0x209   :  { %860 = vst [vmem:[%s1269_s5] sm:$0xff] %v855_v53  ;;  %v1058_v56 = vpop.f32.mrb[11].mxu0 }
 0x20a   :  { %865 = vsyncpa [#allocation4], 1 }

</bundles_post_ra>
